<compile_context>
chip_gen: v5e
topology: v5e:2x2
jax: 0.10.0
libtpu: 0.0.40
codegen_flags: <defaults>
</compile_context>

<pallas_src>
import functools

import jax
import jax.numpy as jnp
from jax.experimental import pallas as pl
from jax.experimental.pallas import tpu as pltpu


def _log_sigmoid(z):
    # log(sigmoid(z)) = min(z, 0) - log(1 + exp(-|z|))  -> one exp + one log (EUP)
    return jnp.minimum(z, 0.0) - jnp.log(1.0 + jnp.exp(-jnp.abs(z)))


def _stable_sigmoid(z):
    # sigmoid(z) with one exp + one divide; exact f32 (no approx reciprocal so
    # the summed loss stays within tight tolerances).
    e = jnp.exp(-jnp.abs(z))
    return jnp.where(z >= 0.0, 1.0, e) / (1.0 + e)


def _int_pow(x, g):
    """x**g for a small non-negative Python int g via VPU multiplies only."""
    if g <= 0:
        return jnp.ones_like(x)
    result = None
    base = x
    while g:
        if g & 1:
            result = base if result is None else result * base
        g >>= 1
        if g:
            base = base * base
    return result


def _num_tensorcores():
    """2 when the 'parallel' grid axis can actually shard across cores."""
    try:
        kind = (jax.devices()[0].device_kind or "").lower()
    except Exception:
        return 1
    if "v7" in kind:
        return 2
    if "v4" in kind or "v5p" in kind:   # megacore chips
        return 2
    return 1                             # v5e / v6e: single TensorCore


def _am_binary_loss_kernel(cos_ref, tgt_ref, out_ref, *,
                           m, k, s, label_smooth, gamma_neg, gamma_pos, clip,
                           n_valid_rows, block_rows, int_gamma_pow):
    inner = pl.program_id(1)

    @pl.when(inner == 0)
    def _():
        out_ref[...] = jnp.zeros_like(out_ref)

    # Logical (unclamped) block index -> global row offset of this block.
    blk = pl.program_id(0) * pl.num_programs(1) + inner
    row0 = blk * block_rows

    x = cos_ref[...].astype(jnp.float32)
    t_raw = tgt_ref[...].astype(jnp.float32)
    br, c = x.shape

    # Validity mask: element-level ignore (targets < 0) AND rows beyond the
    # real extent (ragged last block / wasted super-block steps). This
    # replaces any host-side padding -> no extra HBM pass.
    row_idx = row0 + jax.lax.broadcasted_iota(jnp.int32, (br, c), 0)
    valid = (t_raw >= 0.0) & (row_idx < n_valid_rows)

    t = jnp.where(valid, t_raw, 0.0)
    if label_smooth > 0:
        t = t * (1.0 - label_smooth)
        t = jnp.where(t == 0.0, label_smooth, t)
    anti_t = 1.0 - t

    zp = s * (x - m)     # logit of xs_pos
    zn = -s * (x + m)    # logit of xs_neg
    bk_pos = k / s
    bk_neg = (1.0 - k) / s

    asymmetric_focus = (gamma_neg > 0) or (gamma_pos > 0)
    if asymmetric_focus:
        # Stable sigmoid (exp + divide), then one log per branch: 3 EUP-class
        # ops per side instead of 4 (no exp(log_sigmoid) round trip).
        xs_pos = _stable_sigmoid(zp)
        log_pos = jnp.log(xs_pos)
        xs_neg = _stable_sigmoid(zn)
        if clip is not None and clip > 0:
            # PyTorch clips xs_neg before both the focal weight and the log.
            xs_neg = jnp.minimum(xs_neg + clip, 1.0)
        log_neg = jnp.log(xs_neg)
        pt = xs_neg * t + xs_pos * anti_t
        if int_gamma_pow is not None:
            # Binarized targets + integer gammas: pure VPU multiplies + select,
            # removes the exp/log pair of the general pow path.
            gp, gn = int_gamma_pow
            wp = _int_pow(pt, gp)
            if gp == gn:
                one_sided_w = wp
            else:
                wn = _int_pow(pt, gn)
                one_sided_w = jnp.where(t > 0.5, wp, wn)
        else:
            one_sided_gamma = gamma_pos * t + gamma_neg * anti_t
            safe_pt = jnp.maximum(pt, 1e-30)
            one_sided_w = jnp.exp(one_sided_gamma * jnp.log(safe_pt))
        loss = (bk_pos * t * log_pos + bk_neg * anti_t * log_neg) * one_sided_w
    else:
        loss = bk_pos * t * _log_sigmoid(zp) + bk_neg * anti_t * _log_sigmoid(zn)

    loss = jnp.where(valid, loss, 0.0)

    # vreg-shaped accumulation: group rows into (8, c) tiles and add them
    # (VPU adds only, no XLU cross-lane reduce; the reshape is aligned to the
    # (8, 128) tiling so it stays layout-free).
    out_ref[...] += loss.reshape(br // 8, 8, c).sum(axis=0)


def am_binary_loss(cos_theta, targets, *, m=0.35, k=0.8, s=30.0, eps=1e-8,
                   label_smooth=0.0, gamma_neg=0, gamma_pos=0,
                   probability_margin=0.05, scale=None,
                   aug_index=None, lam=None,
                   block_rows=None, num_parallel=None,
                   vmem_budget_bytes=28 << 20):
    """JAX wrapper reproducing AMBinaryLoss.forward (returns a scalar)."""
    # Mixup-style target augmentation (matches the PyTorch reference: blend,
    # clamp(0, 1), then filter -- note that blending can un-ignore -1 entries;
    # that is the reference semantics, reproduced faithfully here).
    mixup = aug_index is not None and lam is not None
    if mixup:
        aug_targets = targets[aug_index]
        targets = jnp.clip(targets * lam + aug_targets * (1.0 - lam), 0.0, 1.0)
    s_eff = float(scale) if scale else float(s)

    n, c = cos_theta.shape
    if n == 0 or c == 0:
        # PyTorch returns 0.0 when everything is filtered / empty batch.
        return jnp.asarray(0.0, jnp.float32)

    asymmetric_focus = (gamma_neg > 0) or (gamma_pos > 0)

    # ---- Lane-dense retiling when C is not a multiple of 128 ----------------
    LANE = 128
    if c % LANE == 0:
        rows, lane_w = n, c
        cos2d, tgt2d = cos_theta, targets
    else:
        total = n * c
        lane_w = 0
        for cand in (1024, 512, 256, 128):
            if cand <= total and total % cand == 0:
                lane_w = cand
                break
        if lane_w == 0:
            lane_w = min(512, ((total + LANE - 1) // LANE) * LANE)
        rows = -(-total // lane_w)
        pad_elems = rows * lane_w - total
        cos_flat = cos_theta.reshape(-1)
        tgt_flat = targets.reshape(-1)
        if pad_elems:
            # < lane_w padded elements; their targets are -1 -> masked like
            # regular "ignore" entries inside the kernel.
            cos_flat = jnp.pad(cos_flat, (0, pad_elems))
            tgt_flat = jnp.pad(tgt_flat, (0, pad_elems), constant_values=-1)
        cos2d = cos_flat.reshape(rows, lane_w)
        tgt2d = tgt_flat.reshape(rows, lane_w)

    cos_item = jnp.dtype(cos2d.dtype).itemsize
    tgt_item = jnp.dtype(tgt2d.dtype).itemsize

    # ---- Row-block sizing from a VMEM budget that includes the block-sized
    #      f32 intermediates of the elementwise pipeline, not just IO buffers.
    live_temps = 12 if asymmetric_focus else 6
    per_row_bytes = lane_w * (2 * (cos_item + tgt_item) + 4 * live_temps)
    if block_rows is None:
        block_rows = max(8, (int(vmem_budget_bytes) // per_row_bytes) // 8 * 8)
        # Keep any single input block <= 8 MiB (DMA efficiency vs. VMEM headroom).
        max_in_rows = max(8, ((8 << 20) // (lane_w * max(cos_item, tgt_item))) // 8 * 8)
        block_rows = min(block_rows, max_in_rows)
    block_rows = max(8, (int(block_rows) // 8) * 8)
    rows_padded8 = ((rows + 7) // 8) * 8
    block_rows = min(block_rows, rows_padded8)

    n_blocks = pl.cdiv(rows, block_rows)
    if num_parallel is None:
        num_parallel = _num_tensorcores()
    p = max(1, min(int(num_parallel), n_blocks))       # super-blocks across TCs
    n_inner = pl.cdiv(n_blocks, p)                     # sequential reduction/core
    last_blk = n_blocks - 1

    # Integer-gamma fast path requires binarized targets.
    int_gamma_pow = None
    if (asymmetric_focus and label_smooth == 0 and not mixup
            and float(gamma_pos).is_integer() and float(gamma_neg).is_integer()
            and 0 <= int(gamma_pos) <= 8 and 0 <= int(gamma_neg) <= 8):
        int_gamma_pow = (int(gamma_pos), int(gamma_neg))

    kernel = functools.partial(
        _am_binary_loss_kernel, m=float(m), k=float(k), s=s_eff,
        label_smooth=float(label_smooth), gamma_neg=float(gamma_neg),
        gamma_pos=float(gamma_pos), clip=probability_margin,
        n_valid_rows=int(rows), block_rows=int(block_rows),
        int_gamma_pow=int_gamma_pow)

    # VMEM request: double-buffered IO + intermediates + headroom, capped well
    # under the 64 MiB/TC of v7x.
    block_io_bytes = block_rows * lane_w * (cos_item + tgt_item)
    vmem_limit = int(2 * block_io_bytes
                     + 4 * live_temps * block_rows * lane_w + (4 << 20))
    vmem_limit = max(8 << 20, min(vmem_limit, 56 << 20))

    trans_per_elem = 9 if asymmetric_focus else 4
    cost = pl.CostEstimate(
        flops=30 * rows * lane_w,
        transcendentals=trans_per_elem * rows * lane_w,
        bytes_accessed=rows * lane_w * (cos_item + tgt_item) + p * 8 * lane_w * 4)

    if p * n_inner == n_blocks:
        in_index_map = lambda o, i: (o * n_inner + i, 0)
    else:
        # Wasted trailing steps re-read the last block; the in-kernel row mask
        # zeroes their contribution.
        in_index_map = lambda o, i: (jnp.minimum(o * n_inner + i, last_blk), 0)

    partials = pl.pallas_call(
        kernel,
        out_shape=jax.ShapeDtypeStruct((p * 8, lane_w), jnp.float32),
        grid_spec=pltpu.PrefetchScalarGridSpec(
            num_scalar_prefetch=0,
            grid=(p, n_inner),
            in_specs=[
                pl.BlockSpec((block_rows, lane_w), in_index_map),
                pl.BlockSpec((block_rows, lane_w), in_index_map),
            ],
            out_specs=pl.BlockSpec((8, lane_w), lambda o, i: (o, 0)),
        ),
        compiler_params=pltpu.CompilerParams(
            dimension_semantics=("parallel", "arbitrary"),
            vmem_limit_bytes=vmem_limit),
        cost_estimate=cost,
    )(cos2d, tgt2d)

    # Tiny final reduce of the (P*8, lane_w) partials outside the kernel.
    return -jnp.sum(partials)


def _reference_loss(cos_theta, targets, m=0.35, k=0.8, s=30.0,
                    label_smooth=0.0, gamma_neg=0, gamma_pos=0,
                    probability_margin=0.05):
    """Pure-JAX reference mirroring the PyTorch forward (all branches)."""
    cos_theta = cos_theta.astype(jnp.float32)
    targets = targets.astype(jnp.float32)
    valid = targets >= 0.0
    t = jnp.where(valid, targets, 0.0)
    if label_smooth > 0:
        t = t * (1.0 - label_smooth)
        t = jnp.where(t == 0.0, label_smooth, t)
    anti_t = 1.0 - t
    xs_pos = jax.nn.sigmoid(s * (cos_theta - m))
    xs_neg = jax.nn.sigmoid(-s * (cos_theta + m))
    bk_pos, bk_neg = k / s, (1.0 - k) / s
    if gamma_neg > 0 or gamma_pos > 0:
        if probability_margin is not None and probability_margin > 0:
            xs_neg = jnp.minimum(xs_neg + probability_margin, 1.0)
        pt = xs_neg * t + xs_pos * anti_t
        gam = gamma_pos * t + gamma_neg * anti_t
        w = jnp.power(pt, gam)
        loss = (bk_pos * t * jnp.log(xs_pos) + bk_neg * anti_t * jnp.log(xs_neg)) * w
    else:
        loss = bk_pos * t * jnp.log(xs_pos) + bk_neg * anti_t * jnp.log(xs_neg)
    return -jnp.sum(jnp.where(valid, loss, 0.0))


if __name__ == "__main__":
    key = jax.random.PRNGKey(0)
    k1, k2, k3 = jax.random.split(key, 3)

    N, C = 16, 128  # samples x classes (multi-label)
    cos_theta = jax.random.uniform(k1, (N, C), minval=-1.0, maxval=1.0,
                                   dtype=jnp.float32)
    tgt = (jax.random.uniform(k2, (N, C)) < 0.3).astype(jnp.float32)
    ignore = jax.random.uniform(k3, (N, C)) < 0.1        # elements < 0 are ignored
    targets = jnp.where(ignore, -1.0, tgt)

    # 1) Default path (no asymmetric focusing).
    loss = am_binary_loss(cos_theta, targets)
    jax.block_until_ready(loss)
    ref = _reference_loss(cos_theta, targets)
    assert jnp.allclose(loss, ref, rtol=1e-4, atol=1e-3), (loss, ref)

    # 2) Asymmetric focus + label smoothing (general exp/log pow path + clip).
    loss_f = am_binary_loss(cos_theta, targets, gamma_neg=4, gamma_pos=1,
                            label_smooth=0.1)
    jax.block_until_ready(loss_f)
    ref_f = _reference_loss(cos_theta, targets, gamma_neg=4, gamma_pos=1,
                            label_smooth=0.1)
    assert jnp.allclose(loss_f, ref_f, rtol=1e-4, atol=1e-3), (loss_f, ref_f)

    # 3) Asymmetric focus, no smoothing (exercises the integer-gamma VPU path).
    loss_i = am_binary_loss(cos_theta, targets, gamma_neg=4, gamma_pos=1)
    jax.block_until_ready(loss_i)
    ref_i = _reference_loss(cos_theta, targets, gamma_neg=4, gamma_pos=1)
    assert jnp.allclose(loss_i, ref_i, rtol=1e-4, atol=1e-3), (loss_i, ref_i)

    # 4) C not a multiple of 128 (exercises the lane-dense retile + row mask).
    C2 = 80
    cos2 = jax.random.uniform(k1, (N, C2), minval=-1.0, maxval=1.0,
                              dtype=jnp.float32)
    tgt2 = (jax.random.uniform(k2, (N, C2)) < 0.3).astype(jnp.float32)
    ign2 = jax.random.uniform(k3, (N, C2)) < 0.1
    targets2 = jnp.where(ign2, -1.0, tgt2)
    loss_c = am_binary_loss(cos2, targets2, gamma_neg=4, gamma_pos=1)
    jax.block_until_ready(loss_c)
    ref_c = _reference_loss(cos2, targets2, gamma_neg=4, gamma_pos=1)
    assert jnp.allclose(loss_c, ref_c, rtol=1e-4, atol=1e-3), (loss_c, ref_c)

    print("KERNEL_OK")
</pallas_src>

<mosaic_0001>
module attributes {stable_mosaic.version = 11 : i64} {
  func.func @_am_binary_loss_kernel(%arg0: i32, %arg1: i32, %arg2: memref<16x128xf32, #tpu.memory_space<vmem>>, %arg3: memref<16x128xf32, #tpu.memory_space<vmem>>, %arg4: memref<8x128xf32, #tpu.memory_space<vmem>>) attributes {dimension_semantics = [#tpu.dimension_semantics<parallel>, #tpu.dimension_semantics<arbitrary>], iteration_bounds = array<i64: 1, 1>, scalar_prefetch = 0 : i64, scratch_operands = 0 : i64, tpu.core_type = #tpu.core_type<tc>, window_params = [{transform_indices = @transform_0, window_bounds = array<i64: 16, 128>}, {transform_indices = @transform_1, window_bounds = array<i64: 16, 128>}, {transform_indices = @transform_2, window_bounds = array<i64: 8, 128>}]} {
    %c0_i32 = arith.constant 0 : i32
    %0 = arith.cmpi eq, %arg1, %c0_i32 : i32
    %1 = arith.extui %0 : i1 to i32
    %c0_i32_0 = arith.constant 0 : i32
    %2 = arith.cmpi ne, %1, %c0_i32_0 : i32
    scf.if %2 {
      %cst_25 = arith.constant 0.000000e+00 : f32
      %62 = vector.broadcast %cst_25 : f32 to vector<8x128xf32>
      %c0_26 = arith.constant 0 : index
      %c0_27 = arith.constant 0 : index
      %63 = vector.load %arg4[%c0_26, %c0_27] : memref<8x128xf32, #tpu.memory_space<vmem>>, vector<8x128xf32>
      tpu.vector_store %arg4[%c0_26, %c0_27], %62 {strides = array<i32>} : memref<8x128xf32, #tpu.memory_space<vmem>>, vector<8x128xf32>,
    } else {
    }
    %c1_i32 = arith.constant 1 : i32
    %3 = arith.muli %arg0, %c1_i32 : i32
    %4 = arith.addi %3, %arg1 : i32
    %c16_i32 = arith.constant 16 : i32
    %5 = arith.muli %4, %c16_i32 : i32
    %c0 = arith.constant 0 : index
    %c0_1 = arith.constant 0 : index
    %6 = vector.load %arg2[%c0, %c0_1] : memref<16x128xf32, #tpu.memory_space<vmem>>, vector<16x128xf32>
    %c0_2 = arith.constant 0 : index
    %c0_3 = arith.constant 0 : index
    %7 = vector.load %arg3[%c0_2, %c0_3] : memref<16x128xf32, #tpu.memory_space<vmem>>, vector<16x128xf32>
    %8 = tpu.iota {dimensions = array<i32: 0>} : vector<16x128xi32>
    %9 = vector.broadcast %5 : i32 to vector<16x128xi32>
    %10 = arith.addi %9, %8 : vector<16x128xi32>
    %cst = arith.constant 0.000000e+00 : f32
    %11 = vector.broadcast %cst : f32 to vector<16x128xf32>
    %12 = arith.cmpf oge, %7, %11 : vector<16x128xf32>
    %c16_i32_4 = arith.constant 16 : i32
    %13 = vector.broadcast %c16_i32_4 : i32 to vector<16x128xi32>
    %14 = arith.cmpi slt, %10, %13 : vector<16x128xi32>
    %15 = arith.andi %12, %14 : vector<16x128xi1>
    %cst_5 = arith.constant 0.000000e+00 : f32
    %16 = vector.broadcast %cst_5 : f32 to vector<16x128xf32>
    %17 = arith.select %15, %7, %16 : vector<16x128xi1>, vector<16x128xf32>
    %cst_6 = arith.constant 1.000000e+00 : f32
    %18 = vector.broadcast %cst_6 : f32 to vector<16x128xf32>
    %19 = arith.subf %18, %17 : vector<16x128xf32>
    %cst_7 = arith.constant 3.500000e-01 : f32
    %20 = vector.broadcast %cst_7 : f32 to vector<16x128xf32>
    %21 = arith.subf %6, %20 : vector<16x128xf32>
    %cst_8 = arith.constant 3.000000e+01 : f32
    %22 = vector.broadcast %cst_8 : f32 to vector<16x128xf32>
    %23 = arith.mulf %22, %21 : vector<16x128xf32>
    %cst_9 = arith.constant 3.500000e-01 : f32
    %24 = vector.broadcast %cst_9 : f32 to vector<16x128xf32>
    %25 = arith.addf %6, %24 : vector<16x128xf32>
    %cst_10 = arith.constant -3.000000e+01 : f32
    %26 = vector.broadcast %cst_10 : f32 to vector<16x128xf32>
    %27 = arith.mulf %26, %25 : vector<16x128xf32>
    %cst_11 = arith.constant 0.0266666673 : f32
    %28 = vector.broadcast %cst_11 : f32 to vector<16x128xf32>
    %29 = arith.mulf %28, %17 : vector<16x128xf32>
    %cst_12 = arith.constant 0.000000e+00 : f32
    %30 = vector.broadcast %cst_12 : f32 to vector<16x128xf32>
    %31 = arith.minimumf %23, %30 : vector<16x128xf32>
    %32 = math.absf %23 : vector<16x128xf32>
    %cst_13 = arith.constant 0.000000e+00 : f32
    %33 = vector.broadcast %cst_13 : f32 to vector<16x128xf32>
    %34 = arith.subf %33, %32 : vector<16x128xf32>
    %35 = math.exp %34 : vector<16x128xf32>
    %cst_14 = arith.constant 1.000000e+00 : f32
    %36 = vector.broadcast %cst_14 : f32 to vector<16x128xf32>
    %37 = arith.addf %36, %35 : vector<16x128xf32>
    %38 = math.log %37 : vector<16x128xf32>
    %39 = arith.subf %31, %38 : vector<16x128xf32>
    %40 = arith.mulf %29, %39 : vector<16x128xf32>
    %cst_15 = arith.constant 0.00666666683 : f32
    %41 = vector.broadcast %cst_15 : f32 to vector<16x128xf32>
    %42 = arith.mulf %41, %19 : vector<16x128xf32>
    %cst_16 = arith.constant 0.000000e+00 : f32
    %43 = vector.broadcast %cst_16 : f32 to vector<16x128xf32>
    %44 = arith.minimumf %27, %43 : vector<16x128xf32>
    %45 = math.absf %27 : vector<16x128xf32>
    %cst_17 = arith.constant 0.000000e+00 : f32
    %46 = vector.broadcast %cst_17 : f32 to vector<16x128xf32>
    %47 = arith.subf %46, %45 : vector<16x128xf32>
    %48 = math.exp %47 : vector<16x128xf32>
    %cst_18 = arith.constant 1.000000e+00 : f32
    %49 = vector.broadcast %cst_18 : f32 to vector<16x128xf32>
    %50 = arith.addf %49, %48 : vector<16x128xf32>
    %51 = math.log %50 : vector<16x128xf32>
    %52 = arith.subf %44, %51 : vector<16x128xf32>
    %53 = arith.mulf %42, %52 : vector<16x128xf32>
    %54 = arith.addf %40, %53 : vector<16x128xf32>
    %cst_19 = arith.constant 0.000000e+00 : f32
    %55 = vector.broadcast %cst_19 : f32 to vector<16x128xf32>
    %56 = arith.select %15, %54, %55 : vector<16x128xi1>, vector<16x128xf32>
    %c0_20 = arith.constant 0 : index
    %c0_21 = arith.constant 0 : index
    %57 = vector.load %arg4[%c0_20, %c0_21] : memref<8x128xf32, #tpu.memory_space<vmem>>, vector<8x128xf32>
    %58 = vector.shape_cast %56 : vector<16x128xf32> to vector<2x8x128xf32>
    %cst_22 = arith.constant dense<0.000000e+00> : vector<8x128xf32>
    %59 = vector.multi_reduction <add>, %58, %cst_22 [0] : vector<2x8x128xf32> to vector<8x128xf32>
    %60 = arith.addf %57, %59 : vector<8x128xf32>
    %c0_23 = arith.constant 0 : index
    %c0_24 = arith.constant 0 : index
    %61 = vector.load %arg4[%c0_23, %c0_24] : memref<8x128xf32, #tpu.memory_space<vmem>>, vector<8x128xf32>
    tpu.vector_store %arg4[%c0_23, %c0_24], %60 {strides = array<i32>} : memref<8x128xf32, #tpu.memory_space<vmem>>, vector<8x128xf32>,
    return
  }
  func.func @transform_0(%arg0: i32, %arg1: i32) -> (i32, i32) {
    %c1_i32 = arith.constant 1 : i32
    %0 = arith.muli %arg0, %c1_i32 : i32
    %1 = arith.addi %0, %arg1 : i32
    %c0_i32 = arith.constant 0 : i32
    %c0_i32_0 = arith.constant 0 : i32
    return %1, %c0_i32 : i32, i32
  }
  func.func @transform_1(%arg0: i32, %arg1: i32) -> (i32, i32) {
    %c1_i32 = arith.constant 1 : i32
    %0 = arith.muli %arg0, %c1_i32 : i32
    %1 = arith.addi %0, %arg1 : i32
    %c0_i32 = arith.constant 0 : i32
    %c0_i32_0 = arith.constant 0 : i32
    return %1, %c0_i32 : i32, i32
  }
  func.func @transform_2(%arg0: i32, %arg1: i32) -> (i32, i32) {
    %c0_i32 = arith.constant 0 : i32
    %c0_i32_0 = arith.constant 0 : i32
    return %arg0, %c0_i32 : i32, i32
  }
}

</mosaic_0001>

<bundles_post_ra>
// kernel: tpu_custom_call.1
= control target key start
LH: loop header
LB: loop body
LE: loop exit
PB: predicated region body
PF: predicated region fallthrough
CT: control target
= control target key end

     0   :  { %7 = vsyncpa [#allocation3], 0  ;;  %s296_s0 = inlined_call_operand.hbm [shape: f32[16,128], index: 0, kind: input, shape index: {}]   ;;  %s297_s1 = inlined_call_operand.hbm [shape: f32[16,128], index: 1, kind: input, shape index: {}]   ;;  %s298_s2 = inlined_call_operand.hbm [shape: f32[8,128], index: 2, kind: output, shape index: {}]  }
   0x1   :  { %8 = vsyncpa [#allocation6], 0 }
   0x2   :  { %9 = vsyncpa [#allocation4], 0  ;;  %s18_s11 = sshll.u32 %s296_s0, 4  ;;  %s263_s12 = smov [#allocation2]   ;;  %s19_s11 = int_to_ptr.hbm [resolvable:$true] %s18_s11 }
   0x3   :  { %s20_s13 = sshll.u32 %s263_s12, 4  ;;  %s35_s16 = sshll.u32 %s297_s1, 4  ;;  %s21_s13 = int_to_ptr.vmem [resolvable:$true] %s20_s13  ;;  %s36_s16 = int_to_ptr.hbm [resolvable:$true] %s35_s16 }
   0x4   :  { %s264_s17 = smov 128   ;;  %s265_s18 = smov 8  }
   0x5   :  { %26 = dma.hbm_to_vmem [thread:$0]  %s19_s11, 256, %s21_s13, [#allocation3], %s264_s17, %s264_s17, %s265_s18  }
   0x6   :  { %s266_s19 = smov [#allocation5]  }
   0x7   :  { %s37_s20 = sshll.u32 %s266_s19, 4  ;;  %s38_s20 = int_to_ptr.vmem [resolvable:$true] %s37_s20 }
   0x8   :  { %43 = dma.hbm_to_vmem [thread:$0]  %s36_s16, 256, %s38_s20, [#allocation6], %s264_s17, %s264_s17, %s265_s18  }
   0x9   :  { %257 = dma.done.wait [#allocation3], 256  }
   0xa   :  { %258 = vsyncadd [#allocation3], 4294967040 }
   0xb   :  { %259 = dma.done.wait [#allocation6], 256  }
   0xc   :  { %260 = vsyncadd [#allocation6], 4294967040  ;;  %v63_v0 = vld [vmem:[#allocation2] sm:$0xff]  ;;  %v64_v1 = vld [vmem:[#allocation2 + $0x8] sm:$0xff]  ;;  %s267_s0 = smov [#allocation7]   ;;  %s150_s23 = sshll.u32 %s298_s2, 4  ;;  %s151_s23 = int_to_ptr.hbm [resolvable:$true] %s150_s23 }
   0xd   :  { %v161_v2 = vadd.f32 -0.35, %v63_v0  ;;  %v162_v3 = vadd.f32 -0.35, %v64_v1  ;;  %v87_v4 = vadd.f32 0.35, %v63_v0 }
   0xe   :  { %v88_v5 = vadd.f32 0.35, %v64_v1  ;;  %v65_v22 = vld [vmem:[#allocation5] sm:$0xff]  ;;  %v66_v24 = vld [vmem:[#allocation5 + $0x8] sm:$0xff]  ;;  %s148_s1 = sshll.u32 %s267_s0, 4  ;;  %s149_s1 = int_to_ptr.vmem [resolvable:$true] %s148_s1 }
   0xf   :  { %v85_v6 = vmul.f32 30.0, %v161_v2  ;;  %v86_v7 = vmul.f32 30.0, %v162_v3  ;;  %v89_v8 = vmul.f32 -30.0, %v87_v4  ;;  %vm73_vm0 = vcmp.ge.f32.partialorder %v65_v22, 0.0 }
  0x10   :  { %v90_v9 = vmul.f32 -30.0, %v88_v5  ;;  %vm74_vm1 = vcmp.ge.f32.partialorder %v66_v24, 0.0  ;;  %v79_v32 = vsel %vm73_vm0, %v65_v22, 0.0 }
  0x11   :  { %v95_v10 = vand.u32 2147483647, %v85_v6  ;;  %v96_v11 = vand.u32 2147483647, %v86_v7  ;;  %v117_v13 = vand.u32 2147483647, %v89_v8 }
  0x12   :  { %v118_v15 = vand.u32 2147483647, %v90_v9  ;;  %v80_v33 = vsel %vm74_vm1, %v66_v24, 0.0  ;;  %v81_v34 = vsub.f32 1.0, %v79_v32  ;;  %v93_v35 = vmin.f32 %v85_v6, 0.0 }
  0x13   :  { %v97_v12 = vsub.f32 0.0, %v95_v10  ;;  %v98_v14 = vsub.f32 0.0, %v96_v11  ;;  %v119_v17 = vsub.f32 0.0, %v117_v13  ;;  %v82_v37 = vsub.f32 1.0, %v80_v33 }
  0x14   :  { %v120_v19 = vsub.f32 0.0, %v118_v15  ;;  %v94_v38 = vmin.f32 %v86_v7, 0.0  ;;  %v91_v40 = vmul.f32 0.026666667, %v79_v32  ;;  %v115_v42 = vmin.f32 %v89_v8, 0.0 }
  0x15   :  { %v99_v16 = vmul.f32 1.442695, %v97_v12  ;;  %v101_v18 = vmul.f32 1.442695, %v98_v14  ;;  %v121_v20 = vmul.f32 1.442695, %v119_v17 }
  0x16   :  { %v123_v21 = vmul.f32 1.442695, %v120_v19  ;;  %v92_v44 = vmul.f32 0.026666667, %v80_v33  ;;  %v116_v46 = vmin.f32 %v90_v9, 0.0 }
  0x17   :  { %169 = vpow2.f32 %v99_v16  ;;  %v113_v49 = vmul.f32 0.006666667, %v81_v34  ;;  %v114_v52 = vmul.f32 0.006666667, %v82_v37 }
  0x18   :  { %171 = vpow2.f32 %v101_v18 }
  0x19   :  { %173 = vpow2.f32 %v121_v20 }
  0x1a   :  { %175 = vpow2.f32 %v123_v21 }
  0x1d   :  { %v170_v23 = vpop.eup %169 }
  0x1e   :  { %v172_v25 = vpop.eup %171  ;;  %v103_v26 = vadd.f32 1.0, %v170_v23 }
  0x1f   :  { %v174_v27 = vpop.eup %173  ;;  %v104_v28 = vadd.f32 1.0, %v172_v25 }
  0x20   :  { %v176_v29 = vpop.eup %175  ;;  %177 = vlog2.f32 %v103_v26  ;;  %v125_v30 = vadd.f32 1.0, %v174_v27 }
  0x21   :  { %179 = vlog2.f32 %v104_v28  ;;  %v126_v31 = vadd.f32 1.0, %v176_v29 }
  0x22   :  { %181 = vlog2.f32 %v125_v30 }
  0x23   :  { %183 = vlog2.f32 %v126_v31 }
  0x26   :  { %v178_v36 = vpop.eup %177 }
  0x27   :  { %v180_v39 = vpop.eup %179  ;;  %v106_v41 = vmul.f32 0.6931472, %v178_v36 }
  0x28   :  { %v182_v43 = vpop.eup %181  ;;  %v108_v45 = vmul.f32 0.6931472, %v180_v39 }
  0x29   :  { %v184_v47 = vpop.eup %183  ;;  %v109_v48 = vsub.f32 %v93_v35, %v106_v41  ;;  %v128_v50 = vmul.f32 0.6931472, %v182_v43 }
  0x2a   :  { %v110_v51 = vsub.f32 %v94_v38, %v108_v45  ;;  %v130_v53 = vmul.f32 0.6931472, %v184_v47 }
  0x2b   :  { %v111_v54 = vmul.f32 %v109_v48, %v91_v40  ;;  %v131_v55 = vsub.f32 %v115_v42, %v128_v50 }
  0x2c   :  { %v112_v56 = vmul.f32 %v110_v51, %v92_v44  ;;  %v132_v57 = vsub.f32 %v116_v46, %v130_v53 }
  0x2d   :  { %v133_v58 = vmul.f32 %v131_v55, %v113_v49 }
  0x2e   :  { %v134_v59 = vmul.f32 %v132_v57, %v114_v52 }
  0x2f   :  { %v135_v60 = vadd.f32 %v133_v58, %v111_v54 }
  0x30   :  { %v136_v61 = vadd.f32 %v134_v59, %v112_v56 }
  0x31   :  { %v137_v62 = vsel %vm73_vm0, %v135_v60, 0.0 }
  0x32   :  { %v138_v63 = vsel %vm74_vm1, %v136_v61, 0.0 }
  0x33   :  { %v140_v0 = vadd.f32 %v138_v63, %v137_v62 }
  0x35   :  { %142 = vst [vmem:[#allocation7] sm:$0xff] %v140_v0 }
  0x36   :  { %153 = dma.vmem_to_hbm [thread:$0]  %s149_s1, 128, %s151_s23, [#allocation4]  }
  0x37   :  { %261 = dma.done.wait [#allocation4], 128  }
  0x38   :  { %262 = vsyncadd [#allocation4], 4294967168 }
  0x39   :  { %158 = vsyncpa [#allocation3], 1 }
  0x3a   :  { %159 = vsyncpa [#allocation6], 1 }
  0x3b   :  { %160 = vsyncpa [#allocation4], 1 }

</bundles_post_ra>
